<compile_context>
chip_gen: v7x
topology: tpu7x:2x2x1
jax: 0.10.0
libtpu: 0.0.40
codegen_flags: <defaults>
</compile_context>

<pallas_src>
import jax
import jax.numpy as jnp
from jax.experimental import pallas as pl
from jax.experimental.pallas import tpu as pltpu

KSIZE = 3   # conv kernel size (padding = 1 -> "same")


def _bigger_cnn_lstm_kernel(
    # inputs
    x_ref,                        # (B, T, Cin)  f32
    w1_ref, b1_ref,               # (K, Cin, C1) bf16, (1, C1) f32   conv1 (BN folded)
    w2_ref, b2_ref,               # (K, C1, C2)  bf16, (1, C2) f32   conv2 (BN folded)
    wih_ref, blstm_ref, whh_ref,  # (C2, 4H) bf16, (1, 4H) f32, (H, 4H) bf16  fused gates [i|f|o|g]
    bns_ref, bnb_ref,             # (1, H), (1, H)  f32              BN after LSTM (eval affine)
    fc1w_ref, fc1b_ref,           # (H, F1) bf16, (1, F1) f32        fc1 (BN folded)
    fc2w_ref, fc2b_ref,           # (F1, F2) bf16, (1, F2) f32
    outw_ref, outb_ref,           # (F2, O) bf16, (1, O) f32
    # output
    o_ref,                        # (B, O) f32
    # scratch
    xpad1_ref,                    # (B, T+2, Cin)    zero-padded conv1 input
    y1_ref,                       # (B*T, C1)        conv1 output (pre-pool)
    xpad2_ref,                    # (B, T//2+2, C1)  zero-padded conv2 input
    y2_ref,                       # (B*T//2, C2)     conv2 output (pre-pool)
    zall_ref,                     # (B*T//4, 4H)     hoisted fused gate projections
):
    f32 = jnp.float32
    bf16 = jnp.bfloat16
    B, T, CIN = x_ref.shape
    C1 = w1_ref.shape[2]
    H = whh_ref.shape[0]
    T2, T4 = T // 2, T // 4

    def conv_relu_pool(x3d, xpad_ref_, y_ref_, w_ref_, b_ref_, tin, cin):
        """Conv1d(k=3, pad=1) + folded BN + ReLU + MaxPool1d(2), slab form."""
        # Write only the two pad time-rows as zeros; interior written once.
        xpad_ref_[:, 0:1, :] = jnp.zeros((B, 1, cin), f32)
        xpad_ref_[:, tin + 1:tin + 2, :] = jnp.zeros((B, 1, cin), f32)
        xpad_ref_[:, 1:tin + 1, :] = x3d
        # 3 shifted-window slab matmuls: y[:, t] = sum_k xpad[:, t+k] @ W[k]
        # bf16 operands, f32 accumulation; chained dots -> MRB accumulation on v7x.
        acc = None
        for k in range(KSIZE):
            win = xpad_ref_[:, k:k + tin, :].reshape(B * tin, cin).astype(bf16)
            contrib = jnp.dot(win, w_ref_[k], preferred_element_type=f32)
            acc = contrib if acc is None else acc + contrib
        # one slab bias-add + ReLU
        y_ref_[...] = jnp.maximum(acc + b_ref_[...], 0.0)            # (B*tin, cout)
        # MaxPool1d(kernel=2, stride=2): rows are batch-major / time-minor and
        # tin is even, so even time frames are exactly the even rows.
        half = (B * tin) // 2
        return jnp.maximum(y_ref_[pl.ds(0, half, stride=2), :],
                           y_ref_[pl.ds(1, half, stride=2), :])      # (B*tin//2, cout)

    p1 = conv_relu_pool(x_ref[...], xpad1_ref, y1_ref, w1_ref, b1_ref,
                        T, CIN)                                      # (B*T2, C1)
    p2 = conv_relu_pool(p1.reshape(B, T2, C1), xpad2_ref, y2_ref, w2_ref, b2_ref,
                        T2, C1)                                      # (B*T4, C2)

    # ---- LSTM input projection, hoisted and fused over all 4 gates ----
    # One (B*T4, C2) @ (C2, 4H=128) matmul + one (1,128) bias, stored once as a
    # lane-dense 128-wide slab (unmasked vst).  Gate lane order is [i, f, o, g].
    zall_ref[...] = (jnp.dot(p2.astype(bf16), wih_ref[...],
                             preferred_element_type=f32) + blstm_ref[...])

    # ---- single-layer unidirectional LSTM recurrence (zero init state) ----
    # One fused (B,H)@(H,128) dot per step; one sigmoid over lanes 0:3H and one
    # tanh over lanes 3H:4H (+ tanh(c)) on the serial chain.
    h = jnp.zeros((B, H), f32)
    c = jnp.zeros((B, H), f32)
    for t in range(T4):
        # rows b*T4 + t for each batch b (batch-major / time-minor slab)
        zt = zall_ref[pl.ds(t, B, stride=T4), :]                       # (B, 4H)
        g_all = zt + jnp.dot(h.astype(bf16), whh_ref[...],
                             preferred_element_type=f32)               # (B, 4H)
        sig = jax.nn.sigmoid(g_all[:, :3 * H])                         # i | f | o
        i_g = sig[:, 0:H]
        f_g = sig[:, H:2 * H]
        o_g = sig[:, 2 * H:3 * H]
        g_g = jnp.tanh(g_all[:, 3 * H:])                               # g
        c = f_g * c + i_g * g_g
        h = o_g * jnp.tanh(c)
    # lstm_position = -1  ->  last hidden state == h

    # ---- BatchNorm1d (eval affine) + ReLU ----
    y = jnp.maximum(h * bns_ref[...] + bnb_ref[...], 0.0)
    # ---- fc1 (Linear + folded BN) + ReLU (Dropout == identity in eval) ----
    y = jnp.maximum(jnp.dot(y.astype(bf16), fc1w_ref[...],
                            preferred_element_type=f32) + fc1b_ref[...], 0.0)
    # ---- fc2 (Linear) + ReLU ----
    y = jnp.maximum(jnp.dot(y.astype(bf16), fc2w_ref[...],
                            preferred_element_type=f32) + fc2b_ref[...], 0.0)
    # ---- output layer + Softmax(dim=1) ----
    logits = (jnp.dot(y.astype(bf16), outw_ref[...],
                      preferred_element_type=f32) + outb_ref[...])
    m = jnp.max(logits, axis=1, keepdims=True)
    e = jnp.exp(logits - m)
    o_ref[...] = e / jnp.sum(e, axis=1, keepdims=True)


def bigger_cnn_lstm_forward(x, params):
    """x: (B, T, n_mfcc) float32.  params: tuple in kernel argument order."""
    B, T, CIN = x.shape
    assert T % 4 == 0, "two MaxPool1d(2) layers assume T divisible by 4"
    C1 = params[0].shape[2]          # w1_taps is (K, Cin, C1)
    C2 = params[2].shape[2]          # w2_taps is (K, C1, C2)
    H4 = params[6].shape[1]          # whh_cat is (H, 4H)
    NOUT = params[-2].shape[1]       # outw is (F2, O)
    T2, T4 = T // 2, T // 4
    f32 = jnp.float32
    n_in = 1 + len(params)
    scratch = [
        pltpu.VMEM((B, T + 2, CIN), f32),     # padded conv1 input
        pltpu.VMEM((B * T, C1), f32),         # conv1 output (pre-pool)
        pltpu.VMEM((B, T2 + 2, C1), f32),     # padded conv2 input
        pltpu.VMEM((B * T2, C2), f32),        # conv2 output (pre-pool)
        pltpu.VMEM((B * T4, H4), f32),        # fused gate projections [i|f|o|g]
    ]
    return pl.pallas_call(
        _bigger_cnn_lstm_kernel,
        out_shape=jax.ShapeDtypeStruct((B, NOUT), f32),
        in_specs=[pl.BlockSpec(memory_space=pltpu.MemorySpace.VMEM)] * n_in,
        out_specs=pl.BlockSpec(memory_space=pltpu.MemorySpace.VMEM),
        scratch_shapes=scratch,
    )(x, *params)


def make_params(key, cin=4, c1=8, c2=16, hidden=32, f1=32, f2=16, nout=4):
    ks = jax.random.split(key, 14)
    rnd = lambda k_, shape: jax.random.normal(k_, shape, jnp.float32) * 0.1
    eps = 1e-5
    bf16 = jnp.bfloat16

    def bn_affine(c):
        # freshly-initialized BatchNorm in eval mode: gamma=1, beta=0, mean=0, var=1
        gamma = jnp.ones((c,), jnp.float32)
        beta = jnp.zeros((c,), jnp.float32)
        mean = jnp.zeros((c,), jnp.float32)
        var = jnp.ones((c,), jnp.float32)
        s = gamma / jnp.sqrt(var + eps)
        return s, beta - mean * s

    # conv1 + folded BN   (PyTorch Conv1d weight is (Cout, Cin, K))
    w1 = rnd(ks[0], (c1, cin, KSIZE)); b1 = rnd(ks[1], (c1,))
    s1, t1 = bn_affine(c1)
    w1_taps = (jnp.transpose(w1, (2, 1, 0)) * s1[None, None, :]).astype(bf16)   # (K, Cin, C1)
    b1_eff = (b1 * s1 + t1).reshape(1, c1)

    # conv2 + folded BN
    w2 = rnd(ks[2], (c2, c1, KSIZE)); b2 = rnd(ks[3], (c2,))
    s2, t2 = bn_affine(c2)
    w2_taps = (jnp.transpose(w2, (2, 1, 0)) * s2[None, None, :]).astype(bf16)   # (K, C1, C2)
    b2_eff = (b2 * s2 + t2).reshape(1, c2)

    # LSTM: PyTorch row gate order is i, f, g, o.  Fuse into one (in, 4H) matrix
    # with lane order [i, f, o, g] so one sigmoid covers lanes 0:3H and one tanh
    # covers lanes 3H:4H inside the kernel.
    w_ih = rnd(ks[4], (4 * hidden, c2)); w_hh = rnd(ks[5], (4 * hidden, hidden))
    b_ih = rnd(ks[6], (4 * hidden,));    b_hh = rnd(ks[7], (4 * hidden,))
    order = (0, 1, 3, 2)   # i, f, o, g

    def gate_cols(w, g):
        return w[g * hidden:(g + 1) * hidden, :].T

    wih_cat = jnp.concatenate([gate_cols(w_ih, g) for g in order], axis=1).astype(bf16)  # (C2, 4H)
    whh_cat = jnp.concatenate([gate_cols(w_hh, g) for g in order], axis=1).astype(bf16)  # (H, 4H)
    bsum = b_ih + b_hh
    blstm = jnp.concatenate(
        [bsum[g * hidden:(g + 1) * hidden] for g in order]).reshape(1, 4 * hidden)       # (1, 4H)

    # BatchNorm after LSTM (kept as elementwise affine in-kernel)
    sl, tl = bn_affine(hidden)
    bns = sl.reshape(1, hidden); bnb = tl.reshape(1, hidden)

    # fc1 (Linear + folded BN); dropout is identity in eval mode
    wf1 = rnd(ks[8], (f1, hidden)); bfc1 = rnd(ks[9], (f1,))
    sf1, tf1 = bn_affine(f1)
    fc1w = (wf1.T * sf1[None, :]).astype(bf16)
    fc1b = (bfc1 * sf1 + tf1).reshape(1, f1)

    # fc2 (no BN)
    wf2 = rnd(ks[10], (f2, f1)); bfc2 = rnd(ks[11], (f2,))
    fc2w = wf2.T.astype(bf16); fc2b = bfc2.reshape(1, f2)

    # output layer
    wo = rnd(ks[12], (nout, f2)); bo = rnd(ks[13], (nout,))
    outw = wo.T.astype(bf16); outb = bo.reshape(1, nout)

    return (w1_taps, b1_eff, w2_taps, b2_eff,
            wih_cat, blstm, whh_cat,
            bns, bnb,
            fc1w, fc1b, fc2w, fc2b,
            outw, outb)


if __name__ == "__main__":
    B, T, CIN = 2, 16, 4       # x: (batch, seq_len, n_mfcc) — module input layout
    NOUT = 4

    key = jax.random.PRNGKey(0)
    kx, kp = jax.random.split(key)
    x = jax.random.normal(kx, (B, T, CIN), jnp.float32)
    params = make_params(kp, cin=CIN, c1=8, c2=16, hidden=32, f1=32, f2=16, nout=NOUT)

    out = bigger_cnn_lstm_forward(x, params)
    out = jax.block_until_ready(out)

    assert out.shape == (B, NOUT)
    # softmax rows should sum to ~1
    assert jnp.allclose(jnp.sum(out, axis=1), 1.0, atol=1e-5)
    print("KERNEL_OK")
</pallas_src>

<mosaic_0001>
module attributes {stable_mosaic.version = 11 : i64} {
  func.func @_bigger_cnn_lstm_kernel(%arg0: memref<2x16x4xf32, #tpu.memory_space<vmem>>, %arg1: memref<3x4x8xbf16, #tpu.memory_space<vmem>>, %arg2: memref<1x8xf32, #tpu.memory_space<vmem>>, %arg3: memref<3x8x16xbf16, #tpu.memory_space<vmem>>, %arg4: memref<1x16xf32, #tpu.memory_space<vmem>>, %arg5: memref<16x128xbf16, #tpu.memory_space<vmem>>, %arg6: memref<1x128xf32, #tpu.memory_space<vmem>>, %arg7: memref<32x128xbf16, #tpu.memory_space<vmem>>, %arg8: memref<1x32xf32, #tpu.memory_space<vmem>>, %arg9: memref<1x32xf32, #tpu.memory_space<vmem>>, %arg10: memref<32x32xbf16, #tpu.memory_space<vmem>>, %arg11: memref<1x32xf32, #tpu.memory_space<vmem>>, %arg12: memref<32x16xbf16, #tpu.memory_space<vmem>>, %arg13: memref<1x16xf32, #tpu.memory_space<vmem>>, %arg14: memref<16x4xbf16, #tpu.memory_space<vmem>>, %arg15: memref<1x4xf32, #tpu.memory_space<vmem>>, %arg16: memref<2x4xf32, #tpu.memory_space<vmem>>, %arg17: memref<2x18x4xf32, #tpu.memory_space<vmem>>, %arg18: memref<32x8xf32, #tpu.memory_space<vmem>>, %arg19: memref<2x10x8xf32, #tpu.memory_space<vmem>>, %arg20: memref<16x16xf32, #tpu.memory_space<vmem>>, %arg21: memref<8x128xf32, #tpu.memory_space<vmem>>) attributes {dimension_semantics = [], scalar_prefetch = 0 : i64, scratch_operands = 5 : i64, tpu.core_type = #tpu.core_type<tc>} {
    %c0 = arith.constant 0 : index
    %c0_0 = arith.constant 0 : index
    %c0_1 = arith.constant 0 : index
    %0 = vector.load %arg0[%c0, %c0_0, %c0_1] : memref<2x16x4xf32, #tpu.memory_space<vmem>>, vector<2x16x4xf32>
    %cst = arith.constant 0.000000e+00 : f32
    %1 = vector.broadcast %cst : f32 to vector<2x1x4xf32>
    %c0_2 = arith.constant 0 : index
    %c0_3 = arith.constant 0 : index
    %c0_4 = arith.constant 0 : index
    %2 = vector.load %arg17[%c0_2, %c0_3, %c0_4] : memref<2x18x4xf32, #tpu.memory_space<vmem>>, vector<2x1x4xf32>
    tpu.vector_store %arg17[%c0_2, %c0_3, %c0_4], %1 {strides = array<i32>} : memref<2x18x4xf32, #tpu.memory_space<vmem>>, vector<2x1x4xf32>,
    %cst_5 = arith.constant 0.000000e+00 : f32
    %3 = vector.broadcast %cst_5 : f32 to vector<2x1x4xf32>
    %c0_6 = arith.constant 0 : index
    %c17 = arith.constant 17 : index
    %c0_7 = arith.constant 0 : index
    %4 = vector.load %arg17[%c0_6, %c17, %c0_7] : memref<2x18x4xf32, #tpu.memory_space<vmem>>, vector<2x1x4xf32>
    tpu.vector_store %arg17[%c0_6, %c17, %c0_7], %3 {strides = array<i32>} : memref<2x18x4xf32, #tpu.memory_space<vmem>>, vector<2x1x4xf32>,
    %c0_8 = arith.constant 0 : index
    %c1 = arith.constant 1 : index
    %c0_9 = arith.constant 0 : index
    %5 = vector.load %arg17[%c0_8, %c1, %c0_9] : memref<2x18x4xf32, #tpu.memory_space<vmem>>, vector<2x16x4xf32>
    tpu.vector_store %arg17[%c0_8, %c1, %c0_9], %0 {strides = array<i32>} : memref<2x18x4xf32, #tpu.memory_space<vmem>>, vector<2x16x4xf32>,
    %c0_10 = arith.constant 0 : index
    %c0_11 = arith.constant 0 : index
    %c0_12 = arith.constant 0 : index
    %6 = vector.load %arg17[%c0_10, %c0_11, %c0_12] : memref<2x18x4xf32, #tpu.memory_space<vmem>>, vector<2x16x4xf32>
    %7 = vector.shape_cast %6 : vector<2x16x4xf32> to vector<32x4xf32>
    %8 = arith.truncf %7 : vector<32x4xf32> to vector<32x4xbf16>
    %c0_13 = arith.constant 0 : index
    %c0_14 = arith.constant 0 : index
    %c0_15 = arith.constant 0 : index
    %9 = vector.load %arg1[%c0_13, %c0_14, %c0_15] : memref<3x4x8xbf16, #tpu.memory_space<vmem>>, vector<1x4x8xbf16>
    %10 = vector.shape_cast %9 : vector<1x4x8xbf16> to vector<4x8xbf16>
    %cst_16 = arith.constant dense<0.000000e+00> : vector<32x8xf32>
    %11 = tpu.matmul %8, %10, %cst_16 {dimension_numbers = #tpu.dot_dimension_numbers<[1], [0], [0], [1], [0, 0, 1, 1], [], []>} : vector<32x4xbf16>, vector<4x8xbf16>, vector<32x8xf32> -> vector<32x8xf32>
    %c0_17 = arith.constant 0 : index
    %c1_18 = arith.constant 1 : index
    %c0_19 = arith.constant 0 : index
    %12 = vector.load %arg17[%c0_17, %c1_18, %c0_19] : memref<2x18x4xf32, #tpu.memory_space<vmem>>, vector<2x16x4xf32>
    %13 = vector.shape_cast %12 : vector<2x16x4xf32> to vector<32x4xf32>
    %14 = arith.truncf %13 : vector<32x4xf32> to vector<32x4xbf16>
    %c1_20 = arith.constant 1 : index
    %c0_21 = arith.constant 0 : index
    %c0_22 = arith.constant 0 : index
    %15 = vector.load %arg1[%c1_20, %c0_21, %c0_22] : memref<3x4x8xbf16, #tpu.memory_space<vmem>>, vector<1x4x8xbf16>
    %16 = vector.shape_cast %15 : vector<1x4x8xbf16> to vector<4x8xbf16>
    %cst_23 = arith.constant dense<0.000000e+00> : vector<32x8xf32>
    %17 = tpu.matmul %14, %16, %cst_23 {dimension_numbers = #tpu.dot_dimension_numbers<[1], [0], [0], [1], [0, 0, 1, 1], [], []>} : vector<32x4xbf16>, vector<4x8xbf16>, vector<32x8xf32> -> vector<32x8xf32>
    %18 = arith.addf %11, %17 : vector<32x8xf32>
    %c0_24 = arith.constant 0 : index
    %c2 = arith.constant 2 : index
    %c0_25 = arith.constant 0 : index
    %19 = vector.load %arg17[%c0_24, %c2, %c0_25] : memref<2x18x4xf32, #tpu.memory_space<vmem>>, vector<2x16x4xf32>
    %20 = vector.shape_cast %19 : vector<2x16x4xf32> to vector<32x4xf32>
    %21 = arith.truncf %20 : vector<32x4xf32> to vector<32x4xbf16>
    %c2_26 = arith.constant 2 : index
    %c0_27 = arith.constant 0 : index
    %c0_28 = arith.constant 0 : index
    %22 = vector.load %arg1[%c2_26, %c0_27, %c0_28] : memref<3x4x8xbf16, #tpu.memory_space<vmem>>, vector<1x4x8xbf16>
    %23 = vector.shape_cast %22 : vector<1x4x8xbf16> to vector<4x8xbf16>
    %cst_29 = arith.constant dense<0.000000e+00> : vector<32x8xf32>
    %24 = tpu.matmul %21, %23, %cst_29 {dimension_numbers = #tpu.dot_dimension_numbers<[1], [0], [0], [1], [0, 0, 1, 1], [], []>} : vector<32x4xbf16>, vector<4x8xbf16>, vector<32x8xf32> -> vector<32x8xf32>
    %25 = arith.addf %18, %24 : vector<32x8xf32>
    %c0_30 = arith.constant 0 : index
    %c0_31 = arith.constant 0 : index
    %26 = vector.load %arg2[%c0_30, %c0_31] : memref<1x8xf32, #tpu.memory_space<vmem>>, vector<1x8xf32>
    %27 = vector.broadcast %26 : vector<1x8xf32> to vector<32x8xf32>
    %28 = arith.addf %25, %27 : vector<32x8xf32>
    %cst_32 = arith.constant 0.000000e+00 : f32
    %29 = vector.broadcast %cst_32 : f32 to vector<32x8xf32>
    %30 = arith.maximumf %28, %29 : vector<32x8xf32>
    %c0_33 = arith.constant 0 : index
    %c0_34 = arith.constant 0 : index
    %31 = vector.load %arg18[%c0_33, %c0_34] : memref<32x8xf32, #tpu.memory_space<vmem>>, vector<32x8xf32>
    tpu.vector_store %arg18[%c0_33, %c0_34], %30 {strides = array<i32>} : memref<32x8xf32, #tpu.memory_space<vmem>>, vector<32x8xf32>,
    %c0_35 = arith.constant 0 : index
    %c0_36 = arith.constant 0 : index
    %32 = tpu.strided_load %arg18[%c0_35, %c0_36] {strides = array<i32: 2, 1>} : memref<32x8xf32, #tpu.memory_space<vmem>>, vector<16x8xf32>
    %c1_37 = arith.constant 1 : index
    %c0_38 = arith.constant 0 : index
    %33 = tpu.strided_load %arg18[%c1_37, %c0_38] {strides = array<i32: 2, 1>} : memref<32x8xf32, #tpu.memory_space<vmem>>, vector<16x8xf32>
    %34 = arith.maximumf %32, %33 : vector<16x8xf32>
    %35 = vector.shape_cast %34 : vector<16x8xf32> to vector<2x8x8xf32>
    %cst_39 = arith.constant 0.000000e+00 : f32
    %36 = vector.broadcast %cst_39 : f32 to vector<2x1x8xf32>
    %c0_40 = arith.constant 0 : index
    %c0_41 = arith.constant 0 : index
    %c0_42 = arith.constant 0 : index
    %37 = vector.load %arg19[%c0_40, %c0_41, %c0_42] : memref<2x10x8xf32, #tpu.memory_space<vmem>>, vector<2x1x8xf32>
    tpu.vector_store %arg19[%c0_40, %c0_41, %c0_42], %36 {strides = array<i32>} : memref<2x10x8xf32, #tpu.memory_space<vmem>>, vector<2x1x8xf32>,
    %cst_43 = arith.constant 0.000000e+00 : f32
    %38 = vector.broadcast %cst_43 : f32 to vector<2x1x8xf32>
    %c0_44 = arith.constant 0 : index
    %c9 = arith.constant 9 : index
    %c0_45 = arith.constant 0 : index
    %39 = vector.load %arg19[%c0_44, %c9, %c0_45] : memref<2x10x8xf32, #tpu.memory_space<vmem>>, vector<2x1x8xf32>
    tpu.vector_store %arg19[%c0_44, %c9, %c0_45], %38 {strides = array<i32>} : memref<2x10x8xf32, #tpu.memory_space<vmem>>, vector<2x1x8xf32>,
    %c0_46 = arith.constant 0 : index
    %c1_47 = arith.constant 1 : index
    %c0_48 = arith.constant 0 : index
    %40 = vector.load %arg19[%c0_46, %c1_47, %c0_48] : memref<2x10x8xf32, #tpu.memory_space<vmem>>, vector<2x8x8xf32>
    tpu.vector_store %arg19[%c0_46, %c1_47, %c0_48], %35 {strides = array<i32>} : memref<2x10x8xf32, #tpu.memory_space<vmem>>, vector<2x8x8xf32>,
    %c0_49 = arith.constant 0 : index
    %c0_50 = arith.constant 0 : index
    %c0_51 = arith.constant 0 : index
    %41 = vector.load %arg19[%c0_49, %c0_50, %c0_51] : memref<2x10x8xf32, #tpu.memory_space<vmem>>, vector<2x8x8xf32>
    %42 = vector.shape_cast %41 : vector<2x8x8xf32> to vector<16x8xf32>
    %43 = arith.truncf %42 : vector<16x8xf32> to vector<16x8xbf16>
    %c0_52 = arith.constant 0 : index
    %c0_53 = arith.constant 0 : index
    %c0_54 = arith.constant 0 : index
    %44 = vector.load %arg3[%c0_52, %c0_53, %c0_54] : memref<3x8x16xbf16, #tpu.memory_space<vmem>>, vector<1x8x16xbf16>
    %45 = vector.shape_cast %44 : vector<1x8x16xbf16> to vector<8x16xbf16>
    %cst_55 = arith.constant dense<0.000000e+00> : vector<16x16xf32>
    %46 = tpu.matmul %43, %45, %cst_55 {dimension_numbers = #tpu.dot_dimension_numbers<[1], [0], [0], [1], [0, 0, 1, 1], [], []>} : vector<16x8xbf16>, vector<8x16xbf16>, vector<16x16xf32> -> vector<16x16xf32>
    %c0_56 = arith.constant 0 : index
    %c1_57 = arith.constant 1 : index
    %c0_58 = arith.constant 0 : index
    %47 = vector.load %arg19[%c0_56, %c1_57, %c0_58] : memref<2x10x8xf32, #tpu.memory_space<vmem>>, vector<2x8x8xf32>
    %48 = vector.shape_cast %47 : vector<2x8x8xf32> to vector<16x8xf32>
    %49 = arith.truncf %48 : vector<16x8xf32> to vector<16x8xbf16>
    %c1_59 = arith.constant 1 : index
    %c0_60 = arith.constant 0 : index
    %c0_61 = arith.constant 0 : index
    %50 = vector.load %arg3[%c1_59, %c0_60, %c0_61] : memref<3x8x16xbf16, #tpu.memory_space<vmem>>, vector<1x8x16xbf16>
    %51 = vector.shape_cast %50 : vector<1x8x16xbf16> to vector<8x16xbf16>
    %cst_62 = arith.constant dense<0.000000e+00> : vector<16x16xf32>
    %52 = tpu.matmul %49, %51, %cst_62 {dimension_numbers = #tpu.dot_dimension_numbers<[1], [0], [0], [1], [0, 0, 1, 1], [], []>} : vector<16x8xbf16>, vector<8x16xbf16>, vector<16x16xf32> -> vector<16x16xf32>
    %53 = arith.addf %46, %52 : vector<16x16xf32>
    %c0_63 = arith.constant 0 : index
    %c2_64 = arith.constant 2 : index
    %c0_65 = arith.constant 0 : index
    %54 = vector.load %arg19[%c0_63, %c2_64, %c0_65] : memref<2x10x8xf32, #tpu.memory_space<vmem>>, vector<2x8x8xf32>
    %55 = vector.shape_cast %54 : vector<2x8x8xf32> to vector<16x8xf32>
    %56 = arith.truncf %55 : vector<16x8xf32> to vector<16x8xbf16>
    %c2_66 = arith.constant 2 : index
    %c0_67 = arith.constant 0 : index
    %c0_68 = arith.constant 0 : index
    %57 = vector.load %arg3[%c2_66, %c0_67, %c0_68] : memref<3x8x16xbf16, #tpu.memory_space<vmem>>, vector<1x8x16xbf16>
    %58 = vector.shape_cast %57 : vector<1x8x16xbf16> to vector<8x16xbf16>
    %cst_69 = arith.constant dense<0.000000e+00> : vector<16x16xf32>
    %59 = tpu.matmul %56, %58, %cst_69 {dimension_numbers = #tpu.dot_dimension_numbers<[1], [0], [0], [1], [0, 0, 1, 1], [], []>} : vector<16x8xbf16>, vector<8x16xbf16>, vector<16x16xf32> -> vector<16x16xf32>
    %60 = arith.addf %53, %59 : vector<16x16xf32>
    %c0_70 = arith.constant 0 : index
    %c0_71 = arith.constant 0 : index
    %61 = vector.load %arg4[%c0_70, %c0_71] : memref<1x16xf32, #tpu.memory_space<vmem>>, vector<1x16xf32>
    %62 = vector.broadcast %61 : vector<1x16xf32> to vector<16x16xf32>
    %63 = arith.addf %60, %62 : vector<16x16xf32>
    %cst_72 = arith.constant 0.000000e+00 : f32
    %64 = vector.broadcast %cst_72 : f32 to vector<16x16xf32>
    %65 = arith.maximumf %63, %64 : vector<16x16xf32>
    %c0_73 = arith.constant 0 : index
    %c0_74 = arith.constant 0 : index
    %66 = vector.load %arg20[%c0_73, %c0_74] : memref<16x16xf32, #tpu.memory_space<vmem>>, vector<16x16xf32>
    tpu.vector_store %arg20[%c0_73, %c0_74], %65 {strides = array<i32>} : memref<16x16xf32, #tpu.memory_space<vmem>>, vector<16x16xf32>,
    %c0_75 = arith.constant 0 : index
    %c0_76 = arith.constant 0 : index
    %67 = tpu.strided_load %arg20[%c0_75, %c0_76] {strides = array<i32: 2, 1>} : memref<16x16xf32, #tpu.memory_space<vmem>>, vector<8x16xf32>
    %c1_77 = arith.constant 1 : index
    %c0_78 = arith.constant 0 : index
    %68 = tpu.strided_load %arg20[%c1_77, %c0_78] {strides = array<i32: 2, 1>} : memref<16x16xf32, #tpu.memory_space<vmem>>, vector<8x16xf32>
    %69 = arith.maximumf %67, %68 : vector<8x16xf32>
    %70 = arith.truncf %69 : vector<8x16xf32> to vector<8x16xbf16>
    %c0_79 = arith.constant 0 : index
    %c0_80 = arith.constant 0 : index
    %71 = vector.load %arg5[%c0_79, %c0_80] : memref<16x128xbf16, #tpu.memory_space<vmem>>, vector<16x128xbf16>
    %cst_81 = arith.constant dense<0.000000e+00> : vector<8x128xf32>
    %72 = tpu.matmul %70, %71, %cst_81 {dimension_numbers = #tpu.dot_dimension_numbers<[1], [0], [0], [1], [0, 0, 1, 1], [], []>} : vector<8x16xbf16>, vector<16x128xbf16>, vector<8x128xf32> -> vector<8x128xf32>
    %c0_82 = arith.constant 0 : index
    %c0_83 = arith.constant 0 : index
    %73 = vector.load %arg6[%c0_82, %c0_83] : memref<1x128xf32, #tpu.memory_space<vmem>>, vector<1x128xf32>
    %74 = vector.broadcast %73 : vector<1x128xf32> to vector<8x128xf32>
    %75 = arith.addf %72, %74 : vector<8x128xf32>
    %c0_84 = arith.constant 0 : index
    %c0_85 = arith.constant 0 : index
    %76 = vector.load %arg21[%c0_84, %c0_85] : memref<8x128xf32, #tpu.memory_space<vmem>>, vector<8x128xf32>
    tpu.vector_store %arg21[%c0_84, %c0_85], %75 {strides = array<i32>} : memref<8x128xf32, #tpu.memory_space<vmem>>, vector<8x128xf32>,
    %cst_86 = arith.constant 0.000000e+00 : f32
    %77 = vector.broadcast %cst_86 : f32 to vector<2x32xf32>
    %cst_87 = arith.constant 0.000000e+00 : f32
    %78 = vector.broadcast %cst_87 : f32 to vector<2x32xf32>
    %c0_88 = arith.constant 0 : index
    %c0_89 = arith.constant 0 : index
    %79 = tpu.strided_load %arg21[%c0_88, %c0_89] {strides = array<i32: 4, 1>} : memref<8x128xf32, #tpu.memory_space<vmem>>, vector<2x128xf32>
    %80 = arith.truncf %77 : vector<2x32xf32> to vector<2x32xbf16>
    %c0_90 = arith.constant 0 : index
    %c0_91 = arith.constant 0 : index
    %81 = vector.load %arg7[%c0_90, %c0_91] : memref<32x128xbf16, #tpu.memory_space<vmem>>, vector<32x128xbf16>
    %cst_92 = arith.constant dense<0.000000e+00> : vector<2x128xf32>
    %82 = tpu.matmul %80, %81, %cst_92 {dimension_numbers = #tpu.dot_dimension_numbers<[1], [0], [0], [1], [0, 0, 1, 1], [], []>} : vector<2x32xbf16>, vector<32x128xbf16>, vector<2x128xf32> -> vector<2x128xf32>
    %83 = arith.addf %79, %82 : vector<2x128xf32>
    %84 = vector.extract_strided_slice %83 {offsets = [0, 0], sizes = [2, 96], strides = [1, 1]} : vector<2x128xf32> to vector<2x96xf32>
    %85 = arith.negf %84 : vector<2x96xf32>
    %86 = math.exp %85 : vector<2x96xf32>
    %cst_93 = arith.constant 1.000000e+00 : f32
    %87 = vector.broadcast %cst_93 : f32 to vector<2x96xf32>
    %88 = arith.addf %87, %86 : vector<2x96xf32>
    %89 = arith.divf %87, %88 : vector<2x96xf32>
    %90 = vector.extract_strided_slice %89 {offsets = [0, 0], sizes = [2, 32], strides = [1, 1]} : vector<2x96xf32> to vector<2x32xf32>
    %91 = vector.extract_strided_slice %89 {offsets = [0, 32], sizes = [2, 32], strides = [1, 1]} : vector<2x96xf32> to vector<2x32xf32>
    %92 = vector.extract_strided_slice %89 {offsets = [0, 64], sizes = [2, 32], strides = [1, 1]} : vector<2x96xf32> to vector<2x32xf32>
    %93 = vector.extract_strided_slice %83 {offsets = [0, 96], sizes = [2, 32], strides = [1, 1]} : vector<2x128xf32> to vector<2x32xf32>
    %94 = math.tanh %93 : vector<2x32xf32>
    %95 = arith.mulf %91, %78 : vector<2x32xf32>
    %96 = arith.mulf %90, %94 : vector<2x32xf32>
    %97 = arith.addf %95, %96 : vector<2x32xf32>
    %98 = math.tanh %97 : vector<2x32xf32>
    %99 = arith.mulf %92, %98 : vector<2x32xf32>
    %c1_94 = arith.constant 1 : index
    %c0_95 = arith.constant 0 : index
    %100 = tpu.strided_load %arg21[%c1_94, %c0_95] {strides = array<i32: 4, 1>} : memref<8x128xf32, #tpu.memory_space<vmem>>, vector<2x128xf32>
    %101 = arith.truncf %99 : vector<2x32xf32> to vector<2x32xbf16>
    %c0_96 = arith.constant 0 : index
    %c0_97 = arith.constant 0 : index
    %102 = vector.load %arg7[%c0_96, %c0_97] : memref<32x128xbf16, #tpu.memory_space<vmem>>, vector<32x128xbf16>
    %cst_98 = arith.constant dense<0.000000e+00> : vector<2x128xf32>
    %103 = tpu.matmul %101, %102, %cst_98 {dimension_numbers = #tpu.dot_dimension_numbers<[1], [0], [0], [1], [0, 0, 1, 1], [], []>} : vector<2x32xbf16>, vector<32x128xbf16>, vector<2x128xf32> -> vector<2x128xf32>
    %104 = arith.addf %100, %103 : vector<2x128xf32>
    %105 = vector.extract_strided_slice %104 {offsets = [0, 0], sizes = [2, 96], strides = [1, 1]} : vector<2x128xf32> to vector<2x96xf32>
    %106 = arith.negf %105 : vector<2x96xf32>
    %107 = math.exp %106 : vector<2x96xf32>
    %cst_99 = arith.constant 1.000000e+00 : f32
    %108 = vector.broadcast %cst_99 : f32 to vector<2x96xf32>
    %109 = arith.addf %108, %107 : vector<2x96xf32>
    %110 = arith.divf %108, %109 : vector<2x96xf32>
    %111 = vector.extract_strided_slice %110 {offsets = [0, 0], sizes = [2, 32], strides = [1, 1]} : vector<2x96xf32> to vector<2x32xf32>
    %112 = vector.extract_strided_slice %110 {offsets = [0, 32], sizes = [2, 32], strides = [1, 1]} : vector<2x96xf32> to vector<2x32xf32>
    %113 = vector.extract_strided_slice %110 {offsets = [0, 64], sizes = [2, 32], strides = [1, 1]} : vector<2x96xf32> to vector<2x32xf32>
    %114 = vector.extract_strided_slice %104 {offsets = [0, 96], sizes = [2, 32], strides = [1, 1]} : vector<2x128xf32> to vector<2x32xf32>
    %115 = math.tanh %114 : vector<2x32xf32>
    %116 = arith.mulf %112, %97 : vector<2x32xf32>
    %117 = arith.mulf %111, %115 : vector<2x32xf32>
    %118 = arith.addf %116, %117 : vector<2x32xf32>
    %119 = math.tanh %118 : vector<2x32xf32>
    %120 = arith.mulf %113, %119 : vector<2x32xf32>
    %c2_100 = arith.constant 2 : index
    %c0_101 = arith.constant 0 : index
    %121 = tpu.strided_load %arg21[%c2_100, %c0_101] {strides = array<i32: 4, 1>} : memref<8x128xf32, #tpu.memory_space<vmem>>, vector<2x128xf32>
    %122 = arith.truncf %120 : vector<2x32xf32> to vector<2x32xbf16>
    %c0_102 = arith.constant 0 : index
    %c0_103 = arith.constant 0 : index
    %123 = vector.load %arg7[%c0_102, %c0_103] : memref<32x128xbf16, #tpu.memory_space<vmem>>, vector<32x128xbf16>
    %cst_104 = arith.constant dense<0.000000e+00> : vector<2x128xf32>
    %124 = tpu.matmul %122, %123, %cst_104 {dimension_numbers = #tpu.dot_dimension_numbers<[1], [0], [0], [1], [0, 0, 1, 1], [], []>} : vector<2x32xbf16>, vector<32x128xbf16>, vector<2x128xf32> -> vector<2x128xf32>
    %125 = arith.addf %121, %124 : vector<2x128xf32>
    %126 = vector.extract_strided_slice %125 {offsets = [0, 0], sizes = [2, 96], strides = [1, 1]} : vector<2x128xf32> to vector<2x96xf32>
    %127 = arith.negf %126 : vector<2x96xf32>
    %128 = math.exp %127 : vector<2x96xf32>
    %cst_105 = arith.constant 1.000000e+00 : f32
    %129 = vector.broadcast %cst_105 : f32 to vector<2x96xf32>
    %130 = arith.addf %129, %128 : vector<2x96xf32>
    %131 = arith.divf %129, %130 : vector<2x96xf32>
    %132 = vector.extract_strided_slice %131 {offsets = [0, 0], sizes = [2, 32], strides = [1, 1]} : vector<2x96xf32> to vector<2x32xf32>
    %133 = vector.extract_strided_slice %131 {offsets = [0, 32], sizes = [2, 32], strides = [1, 1]} : vector<2x96xf32> to vector<2x32xf32>
    %134 = vector.extract_strided_slice %131 {offsets = [0, 64], sizes = [2, 32], strides = [1, 1]} : vector<2x96xf32> to vector<2x32xf32>
    %135 = vector.extract_strided_slice %125 {offsets = [0, 96], sizes = [2, 32], strides = [1, 1]} : vector<2x128xf32> to vector<2x32xf32>
    %136 = math.tanh %135 : vector<2x32xf32>
    %137 = arith.mulf %133, %118 : vector<2x32xf32>
    %138 = arith.mulf %132, %136 : vector<2x32xf32>
    %139 = arith.addf %137, %138 : vector<2x32xf32>
    %140 = math.tanh %139 : vector<2x32xf32>
    %141 = arith.mulf %134, %140 : vector<2x32xf32>
    %c3 = arith.constant 3 : index
    %c0_106 = arith.constant 0 : index
    %142 = tpu.strided_load %arg21[%c3, %c0_106] {strides = array<i32: 4, 1>} : memref<8x128xf32, #tpu.memory_space<vmem>>, vector<2x128xf32>
    %143 = arith.truncf %141 : vector<2x32xf32> to vector<2x32xbf16>
    %c0_107 = arith.constant 0 : index
    %c0_108 = arith.constant 0 : index
    %144 = vector.load %arg7[%c0_107, %c0_108] : memref<32x128xbf16, #tpu.memory_space<vmem>>, vector<32x128xbf16>
    %cst_109 = arith.constant dense<0.000000e+00> : vector<2x128xf32>
    %145 = tpu.matmul %143, %144, %cst_109 {dimension_numbers = #tpu.dot_dimension_numbers<[1], [0], [0], [1], [0, 0, 1, 1], [], []>} : vector<2x32xbf16>, vector<32x128xbf16>, vector<2x128xf32> -> vector<2x128xf32>
    %146 = arith.addf %142, %145 : vector<2x128xf32>
    %147 = vector.extract_strided_slice %146 {offsets = [0, 0], sizes = [2, 96], strides = [1, 1]} : vector<2x128xf32> to vector<2x96xf32>
    %148 = arith.negf %147 : vector<2x96xf32>
    %149 = math.exp %148 : vector<2x96xf32>
    %cst_110 = arith.constant 1.000000e+00 : f32
    %150 = vector.broadcast %cst_110 : f32 to vector<2x96xf32>
    %151 = arith.addf %150, %149 : vector<2x96xf32>
    %152 = arith.divf %150, %151 : vector<2x96xf32>
    %153 = vector.extract_strided_slice %152 {offsets = [0, 0], sizes = [2, 32], strides = [1, 1]} : vector<2x96xf32> to vector<2x32xf32>
    %154 = vector.extract_strided_slice %152 {offsets = [0, 32], sizes = [2, 32], strides = [1, 1]} : vector<2x96xf32> to vector<2x32xf32>
    %155 = vector.extract_strided_slice %152 {offsets = [0, 64], sizes = [2, 32], strides = [1, 1]} : vector<2x96xf32> to vector<2x32xf32>
    %156 = vector.extract_strided_slice %146 {offsets = [0, 96], sizes = [2, 32], strides = [1, 1]} : vector<2x128xf32> to vector<2x32xf32>
    %157 = math.tanh %156 : vector<2x32xf32>
    %158 = arith.mulf %154, %139 : vector<2x32xf32>
    %159 = arith.mulf %153, %157 : vector<2x32xf32>
    %160 = arith.addf %158, %159 : vector<2x32xf32>
    %161 = math.tanh %160 : vector<2x32xf32>
    %162 = arith.mulf %155, %161 : vector<2x32xf32>
    %c0_111 = arith.constant 0 : index
    %c0_112 = arith.constant 0 : index
    %163 = vector.load %arg8[%c0_111, %c0_112] : memref<1x32xf32, #tpu.memory_space<vmem>>, vector<1x32xf32>
    %164 = vector.broadcast %163 : vector<1x32xf32> to vector<2x32xf32>
    %165 = arith.mulf %162, %164 : vector<2x32xf32>
    %c0_113 = arith.constant 0 : index
    %c0_114 = arith.constant 0 : index
    %166 = vector.load %arg9[%c0_113, %c0_114] : memref<1x32xf32, #tpu.memory_space<vmem>>, vector<1x32xf32>
    %167 = vector.broadcast %166 : vector<1x32xf32> to vector<2x32xf32>
    %168 = arith.addf %165, %167 : vector<2x32xf32>
    %cst_115 = arith.constant 0.000000e+00 : f32
    %169 = vector.broadcast %cst_115 : f32 to vector<2x32xf32>
    %170 = arith.maximumf %168, %169 : vector<2x32xf32>
    %171 = arith.truncf %170 : vector<2x32xf32> to vector<2x32xbf16>
    %c0_116 = arith.constant 0 : index
    %c0_117 = arith.constant 0 : index
    %172 = vector.load %arg10[%c0_116, %c0_117] : memref<32x32xbf16, #tpu.memory_space<vmem>>, vector<32x32xbf16>
    %cst_118 = arith.constant dense<0.000000e+00> : vector<2x32xf32>
    %173 = tpu.matmul %171, %172, %cst_118 {dimension_numbers = #tpu.dot_dimension_numbers<[1], [0], [0], [1], [0, 0, 1, 1], [], []>} : vector<2x32xbf16>, vector<32x32xbf16>, vector<2x32xf32> -> vector<2x32xf32>
    %c0_119 = arith.constant 0 : index
    %c0_120 = arith.constant 0 : index
    %174 = vector.load %arg11[%c0_119, %c0_120] : memref<1x32xf32, #tpu.memory_space<vmem>>, vector<1x32xf32>
    %175 = vector.broadcast %174 : vector<1x32xf32> to vector<2x32xf32>
    %176 = arith.addf %173, %175 : vector<2x32xf32>
    %cst_121 = arith.constant 0.000000e+00 : f32
    %177 = vector.broadcast %cst_121 : f32 to vector<2x32xf32>
    %178 = arith.maximumf %176, %177 : vector<2x32xf32>
    %179 = arith.truncf %178 : vector<2x32xf32> to vector<2x32xbf16>
    %c0_122 = arith.constant 0 : index
    %c0_123 = arith.constant 0 : index
    %180 = vector.load %arg12[%c0_122, %c0_123] : memref<32x16xbf16, #tpu.memory_space<vmem>>, vector<32x16xbf16>
    %cst_124 = arith.constant dense<0.000000e+00> : vector<2x16xf32>
    %181 = tpu.matmul %179, %180, %cst_124 {dimension_numbers = #tpu.dot_dimension_numbers<[1], [0], [0], [1], [0, 0, 1, 1], [], []>} : vector<2x32xbf16>, vector<32x16xbf16>, vector<2x16xf32> -> vector<2x16xf32>
    %c0_125 = arith.constant 0 : index
    %c0_126 = arith.constant 0 : index
    %182 = vector.load %arg13[%c0_125, %c0_126] : memref<1x16xf32, #tpu.memory_space<vmem>>, vector<1x16xf32>
    %183 = vector.broadcast %182 : vector<1x16xf32> to vector<2x16xf32>
    %184 = arith.addf %181, %183 : vector<2x16xf32>
    %cst_127 = arith.constant 0.000000e+00 : f32
    %185 = vector.broadcast %cst_127 : f32 to vector<2x16xf32>
    %186 = arith.maximumf %184, %185 : vector<2x16xf32>
    %187 = arith.truncf %186 : vector<2x16xf32> to vector<2x16xbf16>
    %c0_128 = arith.constant 0 : index
    %c0_129 = arith.constant 0 : index
    %188 = vector.load %arg14[%c0_128, %c0_129] : memref<16x4xbf16, #tpu.memory_space<vmem>>, vector<16x4xbf16>
    %cst_130 = arith.constant dense<0.000000e+00> : vector<2x4xf32>
    %189 = tpu.matmul %187, %188, %cst_130 {dimension_numbers = #tpu.dot_dimension_numbers<[1], [0], [0], [1], [0, 0, 1, 1], [], []>} : vector<2x16xbf16>, vector<16x4xbf16>, vector<2x4xf32> -> vector<2x4xf32>
    %c0_131 = arith.constant 0 : index
    %c0_132 = arith.constant 0 : index
    %190 = vector.load %arg15[%c0_131, %c0_132] : memref<1x4xf32, #tpu.memory_space<vmem>>, vector<1x4xf32>
    %191 = vector.broadcast %190 : vector<1x4xf32> to vector<2x4xf32>
    %192 = arith.addf %189, %191 : vector<2x4xf32>
    %cst_133 = arith.constant dense<0xFF800000> : vector<2xf32>
    %193 = vector.multi_reduction <maximumf>, %192, %cst_133 [1] : vector<2x4xf32> to vector<2xf32>
    %194 = vector.shape_cast %193 : vector<2xf32> to vector<2x1xf32>
    %195 = vector.broadcast %194 : vector<2x1xf32> to vector<2x4xf32>
    %196 = arith.subf %192, %195 : vector<2x4xf32>
    %197 = math.exp %196 : vector<2x4xf32>
    %cst_134 = arith.constant dense<0.000000e+00> : vector<2xf32>
    %198 = vector.multi_reduction <add>, %197, %cst_134 [1] : vector<2x4xf32> to vector<2xf32>
    %199 = vector.shape_cast %198 : vector<2xf32> to vector<2x1xf32>
    %200 = vector.broadcast %199 : vector<2x1xf32> to vector<2x4xf32>
    %201 = arith.divf %197, %200 : vector<2x4xf32>
    %c0_135 = arith.constant 0 : index
    %c0_136 = arith.constant 0 : index
    %202 = vector.load %arg16[%c0_135, %c0_136] : memref<2x4xf32, #tpu.memory_space<vmem>>, vector<2x4xf32>
    tpu.vector_store %arg16[%c0_135, %c0_136], %201 {strides = array<i32>} : memref<2x4xf32, #tpu.memory_space<vmem>>, vector<2x4xf32>,
    return
  }
}

</mosaic_0001>

<bundles_post_ra>
// kernel: tpu_custom_call.1
= control target key start
LH: loop header
LB: loop body
LE: loop exit
PB: predicated region body
PF: predicated region fallthrough
CT: control target
= control target key end

     0   :  { %s1653_s0 = inlined_call_operand.vmem [shape: f32[2,16,4], index: 0, kind: input, shape index: {}]   ;;  %s1654_s1 = inlined_call_operand.vmem [shape: bf16[3,4,8], index: 1, kind: input, shape index: {}]   ;;  %s1655_s2 = inlined_call_operand.vmem [shape: f32[1,8], index: 2, kind: input, shape index: {}]   ;;  %s1656_s3 = inlined_call_operand.vmem [shape: bf16[3,8,16], index: 3, kind: input, shape index: {}]   ;;  %s1657_s4 = inlined_call_operand.vmem [shape: f32[1,16], index: 4, kind: input, shape index: {}]   ;;  %s1658_s5 = inlined_call_operand.vmem [shape: bf16[16,128], index: 5, kind: input, shape index: {}]   ;;  %s1659_s6 = inlined_call_operand.vmem [shape: f32[1,128], index: 6, kind: input, shape index: {}]   ;;  %s1660_s7 = inlined_call_operand.vmem [shape: bf16[32,128], index: 7, kind: input, shape index: {}]   ;;  %s1661_s8 = inlined_call_operand.vmem [shape: f32[1,32], index: 8, kind: input, shape index: {}]   ;;  %s1662_s9 = inlined_call_operand.vmem [shape: f32[1,32], index: 9, kind: input, shape index: {}]   ;;  %s1663_s10 = inlined_call_operand.vmem [shape: bf16[32,32], index: 10, kind: input, shape index: {}]   ;;  %s1664_s11 = inlined_call_operand.vmem [shape: f32[1,32], index: 11, kind: input, shape index: {}]   ;;  %s1665_s12 = inlined_call_operand.vmem [shape: bf16[32,16], index: 12, kind: input, shape index: {}]   ;;  %s1666_s13 = inlined_call_operand.vmem [shape: f32[1,16], index: 13, kind: input, shape index: {}]   ;;  %s1667_s14 = inlined_call_operand.vmem [shape: bf16[16,4], index: 14, kind: input, shape index: {}]   ;;  %s1668_s15 = inlined_call_operand.vmem [shape: f32[1,4], index: 15, kind: input, shape index: {}]   ;;  %s1669_s16 = inlined_call_operand.hbm [shape: f32[2,4], index: 16, kind: output, shape index: {}]  }
   0x1   :  { %1671 = sst [smem:[#allocation10_spill]] %s1653_s0 }
   0x2   :  { %v1097_v0 = vld [vmem:[%s1654_s1 + $0x2] sm:$0x3]  ;;  %vm90_vm0 = vcmask 1041408   ;;  %s1672_s25 = sld [smem:[#allocation10_spill]]  ;;  %vm64_vm1 = vcmask 31744   ;;  %vm59_vm2 = vcmask 24576  }
   0x3   :  { %1278 = vmatprep.subr.msk.bf16.mxu0 %vm90_vm0, %v1097_v0  ;;  %v92_v3 = vsel %vm90_vm0, %v1097_v0, 0  ;;  %v75_v4 = vld [vmem:[%s1654_s1] sm:$0x3]  ;;  %v1355_v7 = vmov 0.0   ;;  %v1102_v18 = vld [vmem:[%s1654_s1 + $0x4] sm:$0x3] }
   0x4   :  { %1175 = vmatpush3.bf16.msra.mxu0 %v92_v3  ;;  %60 = vst.msk [vmem:[#allocation2] sm:$0x1] %vm59_vm2, %v1355_v7  ;;  %61 = vst.msk [vmem:[#allocation2 + $0x18] sm:$0x1] %vm59_vm2, %v1355_v7  ;;  %1192 = vmatprep.subr.bf16.mxu1 %v1355_v7  ;;  %v150_v15 = vsel %vm90_vm0, %v75_v4, 0 }
   0x5   :  { %1279 = vmatprep.subr.msk.bf16.mxu0 %vm90_vm0, %v75_v4  ;;  %62 = vst.msk [vmem:[#allocation2 + $0x11] sm:$0x1] %vm59_vm2, %v1355_v7  ;;  %63 = vst.msk [vmem:[#allocation2 + $0x29] sm:$0x1] %vm59_vm2, %v1355_v7 }
   0x8   :  { %v55_v1 = vld [vmem:[%s1672_s25] sm:$0xff]  ;;  %v56_v2 = vld [vmem:[%s1672_s25 + $0x8] sm:$0xff]  ;;  %v57_v5 = vld [vmem:[%s1672_s25 + $0x10] sm:$0xff] }
   0x9   :  { %65 = vst.msk [vmem:[#allocation2 + $0x1] sm:$0xff] %vm64_vm1, %v55_v1  ;;  %66 = vst.msk [vmem:[#allocation2 + $0x9] sm:$0xff] %vm64_vm1, %v56_v2  ;;  %v58_v6 = vld [vmem:[%s1672_s25 + $0x18] sm:$0xff] }
   0xa   :  { %67 = vst.msk [vmem:[#allocation2 + $0x19] sm:$0xff] %vm64_vm1, %v57_v5  ;;  %68 = vst.msk [vmem:[#allocation2 + $0x21] sm:$0xff] %vm64_vm1, %v58_v6 }
  0x10   :  { %v76_v8 = vld [vmem:[#allocation2 + $0x1] sm:$0xff]  ;;  %v77_v9 = vld [vmem:[#allocation2 + $0x9] sm:$0xff] }
  0x11   :  { %v70_v10 = vld [vmem:[#allocation2 + $0x8] sm:$0xff]  ;;  %v80_v11 = vpack.c.bf16 %v77_v9, %v76_v8  ;;  %v78_v12 = vld [vmem:[#allocation2 + $0x19] sm:$0xff] }
  0x12   :  { %v79_v13 = vld [vmem:[#allocation2 + $0x21] sm:$0xff] }
  0x13   :  { %v81_v14 = vpack.c.bf16 %v79_v13, %v78_v12  ;;  %v69_v16 = vld [vmem:[#allocation2] sm:$0xff]  ;;  %1176 = vmatprep.mubr.msk.bf16.mxu0 %vm64_vm1, %v80_v11 }
  0x14   :  { %v73_v17 = vpack.c.bf16 %v70_v10, %v69_v16 }
  0x15   :  { %1177 = vmatmul.mubr.msk.bf16.vlgmr.msra.gmra.mrb[0].mxu0 %vm64_vm1, %v81_v14 }
  0x16   :  { %21 = vsyncpa [#allocation8], 0  ;;  %1181 = vmatpush3.bf16.msra.mxu0 %v150_v15  ;;  %1182 = vmatprep.mubr.msk.bf16.mxu0 %vm64_vm1, %v73_v17  ;;  %v71_v19 = vld [vmem:[#allocation2 + $0x18] sm:$0xff]  ;;  %v72_v20 = vld [vmem:[#allocation2 + $0x20] sm:$0xff]  ;;  %v216_v25 = vsel %vm90_vm0, %v1102_v18, 0  ;;  %vm300_vm3 = vcmask 57344  }
  0x17   :  { %1280 = vmatprep.subr.msk.bf16.mxu0 %vm90_vm0, %v1102_v18  ;;  %v201_v21 = vld [vmem:[#allocation2 + $0x2] sm:$0xff]  ;;  %v202_v22 = vld [vmem:[#allocation2 + $0xa] sm:$0xff]  ;;  %v74_v23 = vpack.c.bf16 %v72_v20, %v71_v19  ;;  %v203_v26 = vld [vmem:[#allocation2 + $0x1a] sm:$0xff]  ;;  %301 = vst.msk [vmem:[#allocation4] sm:$0x1] %vm300_vm3, %v1355_v7  ;;  %vm319_vm4 = vcmask 1043456  }
  0x18   :  { %v205_v24 = vpack.c.bf16 %v202_v22, %v201_v21  ;;  %v204_v27 = vld [vmem:[#allocation2 + $0x22] sm:$0xff]  ;;  %302 = vst.msk [vmem:[#allocation4 + $0x10] sm:$0x1] %vm300_vm3, %v1355_v7  ;;  %303 = vst.msk [vmem:[#allocation4 + $0x9] sm:$0x1] %vm300_vm3, %v1355_v7  ;;  %vm1356_vm5 = vmmov 0  }
  0x19   :  { %v206_v28 = vpack.c.bf16 %v204_v27, %v203_v26  ;;  %304 = vst.msk [vmem:[#allocation4 + $0x19] sm:$0x1] %vm300_vm3, %v1355_v7  ;;  %v1106_v29 = vld [vmem:[%s1656_s3 + $0x4] sm:$0xf]  ;;  %1194 = vmatprep.mubr.msk.bf16.mxu1 %vm1356_vm5, %v1355_v7  ;;  %v1105_v31 = vld [vmem:[%s1655_s2] ss:$0 sm:$0xff] }
  0x1a   :  { %v321_v30 = vsel %vm319_vm4, %v1106_v29, 0  ;;  %vm286_vm6 = vcmask 64512   ;;  %v310_v50 = vld [vmem:[%s1656_s3] sm:$0xf]  ;;  %v1109_v57 = vld [vmem:[%s1656_s3 + $0x8] sm:$0xf] }
  0x1b   :  { %1193 = vmatpush3.bf16.msra.mxu1 %v321_v30  ;;  %v368_v54 = vsel %vm319_vm4, %v310_v50, 0  ;;  %v420_v59 = vsel %vm319_vm4, %v1109_v57, 0  ;;  %v1287_v63 = vld [vmem:[%s1658_s5] sm:$0xff]   ;;  %v1543_v1 = vld [vmem:[%s1660_s7 + $0x8] sm:$0xff]   ;;  %v1357_v2 = vmov 0   ;;  %vm476_vm7 = vcmask 130048  }
  0x1c   :  { %1198 = vmatprep.subr.bf16.mxu1 %v1355_v7  ;;  %v1537_v0 = vld [vmem:[%s1660_s7] sm:$0xff]   ;;  %s1358_s18 = smov 32   ;;  %vm560_vm8 = vcmask 261120   ;;  %vm1070_vm9 = vcmask 25600  }
  0x1d   :  { %v1111_v15 = vld [vmem:[%s1657_s4] ss:$0 sm:$0xff] }
  0x21   :  { %1183 = vmatmul.mubr.msk.bf16.vlgmr.msra.gmra.mrb[0].mxu0 %vm64_vm1, %v74_v23 }
  0x22   :  { %1187 = vmatpush3.bf16.msra.mxu0 %v216_v25  ;;  %1188 = vmatprep.mubr.msk.bf16.mxu0 %vm64_vm1, %v205_v24 }
  0x23   :  { %1210 = vmatprep.subr.bf16.mxu0 %v1355_v7 }
  0x2d   :  { %1189 = vmatmul.mubr.msk.bf16.vlgmr.msra.gmra.mrb[0].mxu0 %vm64_vm1, %v206_v28 }
  0x2e   :  { %1212 = vmatprep.mubr.msk.bf16.mxu0 %vm1356_vm5, %v1355_v7  ;;  %1211 = vmatpush3.bf16.msra.mxu0 %v1287_v63 }
  0x2f   :  { %1224 = vmatprep.subr.bf16.mxu0 %v1355_v7 }
 0x100   :  { %v1190_v32 = vpop.f32.mrb[0].mxu0 }
 0x101   :  { %v280_v33 = vadd.f32 %v1190_v32, %v1105_v31  ;;  %v252_v34 = vpop.f32.mrb[1].mxu0 }
 0x102   :  { %v278_v35 = vadd.f32 %v1105_v31, %v252_v34  ;;  %v1191_v36 = vpop.f32.mrb[2].mxu0 }
 0x103   :  { %v284_v37 = vmax.f32 %v280_v33, 0.0  ;;  %v281_v38 = vadd.f32 %v1191_v36, %v1105_v31  ;;  %v255_v39 = vpop.f32.mrb[3].mxu0  ;;  %v1112_v33 = vld [vmem:[%s1659_s6] ss:$0 sm:$0xff]  ;;  %s1359_s6 = smov 64  }
 0x104   :  { %v282_v40 = vmax.f32 %v278_v35, 0.0  ;;  %v279_v41 = vadd.f32 %v1105_v31, %v255_v39 }
 0x105   :  { %289 = vst.msk [vmem:[#allocation3 + $0x10] sm:$0xff] %vm286_vm6, %v284_v37  ;;  %v285_v42 = vmax.f32 %v281_v38, 0.0 }
 0x106   :  { %287 = vst.msk [vmem:[#allocation3] sm:$0xff] %vm286_vm6, %v282_v40  ;;  %v283_v43 = vmax.f32 %v279_v41, 0.0 }
 0x107   :  { %290 = vst.msk [vmem:[#allocation3 + $0x18] sm:$0xff] %vm286_vm6, %v285_v42 }
 0x108   :  { %288 = vst.msk [vmem:[#allocation3 + $0x8] sm:$0xff] %vm286_vm6, %v283_v43 }
 0x10e   :  { %v293_v44 = vld [vmem:[#allocation3 + $0x10] ss:$2 sm:$0xff]  ;;  %v297_v45 = vld [vmem:[#allocation3 + $0x11] ss:$2 sm:$0xff] }
 0x10f   :  { %v299_v46 = vmax.f32 %v293_v44, %v297_v45  ;;  %v291_v47 = vld [vmem:[#allocation3] ss:$2 sm:$0xff]  ;;  %v295_v48 = vld [vmem:[#allocation3 + $0x1] ss:$2 sm:$0xff] }
 0x110   :  { %v298_v49 = vmax.f32 %v291_v47, %v295_v48 }
 0x111   :  { %306 = vst.msk [vmem:[#allocation4 + $0x11] sm:$0xff] %vm286_vm6, %v299_v46 }
 0x112   :  { %305 = vst.msk [vmem:[#allocation4 + $0x1] sm:$0xff] %vm286_vm6, %v298_v49 }
 0x118   :  { %v312_v51 = vld [vmem:[#allocation4 + $0x11] sm:$0xff] }
 0x119   :  { %v311_v52 = vld [vmem:[#allocation4 + $0x1] sm:$0xff]  ;;  %v308_v56 = vld [vmem:[#allocation4 + $0x10] sm:$0xff] }
 0x11a   :  { %v313_v53 = vpack.c.bf16 %v312_v51, %v311_v52  ;;  %v307_v55 = vld [vmem:[#allocation4] sm:$0xff]  ;;  %v412_v61 = vld [vmem:[#allocation4 + $0x12] sm:$0xff] }
 0x11b   :  { %v309_v58 = vpack.c.bf16 %v308_v56, %v307_v55  ;;  %v411_v60 = vld [vmem:[#allocation4 + $0x2] sm:$0xff] }
 0x11c   :  { %1195 = vmatmul.mubr.msk.bf16.vlgmr.msra.gmra.mrb[0].mxu1 %vm286_vm6, %v313_v53  ;;  %v413_v62 = vpack.c.bf16 %v412_v61, %v411_v60 }
 0x11d   :  { %1199 = vmatpush3.bf16.msra.mxu1 %v368_v54  ;;  %1200 = vmatprep.mubr.msk.bf16.mxu1 %vm1356_vm5, %v1355_v7 }
 0x11e   :  { %1204 = vmatprep.subr.bf16.mxu1 %v1355_v7 }
 0x124   :  { %1201 = vmatmul.mubr.msk.bf16.vlgmr.msra.gmra.mrb[4].mxu1 %vm286_vm6, %v309_v58 }
 0x125   :  { %1205 = vmatpush3.bf16.msra.mxu1 %v420_v59  ;;  %1206 = vmatprep.mubr.msk.bf16.mxu1 %vm1356_vm5, %v1355_v7 }
 0x126   :  { %1216 = vmatprep.subr.bf16.mxu1 %v1355_v7 }
 0x12c   :  { %1207 = vmatmul.mubr.msk.bf16.vlgmr.msra.gmra.mrb[8].mxu1 %vm286_vm6, %v413_v62 }
 0x12d   :  { %1220 = vmatprep.mubr.msk.bf16.mxu1 %vm1356_vm5, %v1355_v7  ;;  %1217 = vmatpush3.bf16.msra.mxu1 %v1537_v0 }
 0x12e   :  { %1218 = vmatprep.subr.bf16.mxu1 %v1355_v7 }
 0x131   :  { %1219 = vmatpush3.bf16.msra.mxu1 %v1543_v1 }
 0x132   :  { %1232 = vmatprep.subr.bf16.mxu1 %v1355_v7 }
 0x134   :  { %1221 = vmatmul.mubr.bf16.vlgmr.msra.gmra.mrb[12].mxu1 %v1357_v2 }
 0x135   :  { %1233 = vmatpush3.bf16.msra.mxu1 %v1537_v0  ;;  %1236 = vmatprep.mubr.msk.bf16.mxu1 %vm1356_vm5, %v1355_v7 }
 0x136   :  { %1234 = vmatprep.subr.bf16.mxu1 %v1355_v7 }
 0x139   :  { %1235 = vmatpush3.bf16.msra.mxu1 %v1543_v1 }
 0x13a   :  { %1248 = vmatprep.subr.bf16.mxu1 %v1355_v7 }
 0x1ef   :  { %v357_v3 = vpop.f32.mrb[0].mxu1 }
 0x1f0   :  { %v1196_v4 = vpop.f32.mrb[1].mxu1 }
 0x1f1   :  { %v360_v5 = vpop.f32.mrb[2].mxu1 }
 0x1f2   :  { %v1197_v6 = vpop.f32.mrb[3].mxu1 }
 0x1f7   :  { %v404_v8 = vpop.f32.mrb[4].mxu1 }
 0x1f8   :  { %v405_v9 = vadd.f32 %v404_v8, %v357_v3  ;;  %v1202_v10 = vpop.f32.mrb[5].mxu1 }
 0x1f9   :  { %v407_v11 = vpop.f32.mrb[6].mxu1 }
 0x1fa   :  { %v408_v12 = vadd.f32 %v407_v11, %v360_v5  ;;  %v1203_v13 = vpop.f32.mrb[7].mxu1 }
 0x1ff   :  { %v456_v14 = vpop.f32.mrb[8].mxu1 }
 0x200   :  { %v463_v16 = vadd.f32 %v456_v14, %v405_v9  ;;  %v1208_v17 = vpop.f32.mrb[9].mxu1 }
 0x201   :  { %v459_v18 = vpop.f32.mrb[10].mxu1 }
 0x202   :  { %v472_v19 = vadd.f32 %v1111_v15, %v463_v16  ;;  %v464_v20 = vadd.f32 %v459_v18, %v408_v12  ;;  %v1209_v21 = vpop.f32.mrb[11].mxu1 }
 0x204   :  { %v474_v22 = vmax.f32 %v472_v19, 0.0  ;;  %v473_v23 = vadd.f32 %v1111_v15, %v464_v20 }
 0x206   :  { %477 = vst.msk [vmem:[#allocation5] sm:$0xff] %vm476_vm7, %v474_v22  ;;  %v475_v24 = vmax.f32 %v473_v23, 0.0 }
 0x207   :  { %v598_v29 = vpop.f32.mrb[12].mxu1 }
 0x208   :  { %478 = vst.msk [vmem:[#allocation5 + $0x8] sm:$0xff] %vm476_vm7, %v475_v24  ;;  %v1222_v30 = vpop.f32.mrb[13].mxu1 }
 0x209   :  { %v601_v31 = vpop.f32.mrb[14].mxu1 }
 0x20a   :  { %v1223_v32 = vpop.f32.mrb[15].mxu1 }
 0x20f   :  { %v479_v25 = vld [vmem:[#allocation5] ss:$2 sm:$0xff]  ;;  %v481_v26 = vld [vmem:[#allocation5 + $0x1] ss:$2 sm:$0xff] }
 0x210   :  { %v482_v27 = vmax.f32 %v479_v25, %v481_v26 }
 0x212   :  { %v483_v28 = vpack.c.bf16 %v482_v27, %v482_v27 }
 0x214   :  { %1213 = vmatmul.mubr.msk.bf16.vlgmr.msra.gmra.mrb[4].mxu0 %vm476_vm7, %v483_v28 }
 0x215   :  { %1225 = vmatpush3.bf16.msra.mxu0 %v1537_v0  ;;  %1228 = vmatprep.mubr.msk.bf16.mxu0 %vm1356_vm5, %v1355_v7 }
 0x216   :  { %1226 = vmatprep.subr.bf16.mxu0 %v1355_v7 }
 0x219   :  { %1227 = vmatpush3.bf16.msra.mxu0 %v1543_v1 }
 0x21a   :  { %1240 = vmatprep.subr.bf16.mxu0 %v1355_v7 }
 0x2e7   :  { %v536_v34 = vpop.f32.mrb[4].mxu0 }
 0x2e8   :  { %v537_v35 = vadd.f32 %v1112_v33, %v536_v34  ;;  %v1214_v36 = vpop.f32.mrb[5].mxu0 }
 0x2e9   :  { %v539_v37 = vpop.f32.mrb[6].mxu0 }
 0x2ea   :  { %542 = vst [vmem:[#allocation6] sm:$0xff] %v537_v35  ;;  %v1215_v38 = vpop.f32.mrb[7].mxu0 }
 0x2f1   :  { %v543_v39 = vld [vmem:[#allocation6] ss:$4 sm:$0x3]  ;;  %v630_v56 = vld [vmem:[#allocation6 + $0x1] ss:$4 sm:$0x3] }
 0x2f2   :  { %v604_v40 = vadd.f32 %v598_v29, %v543_v39  ;;  %v704_v14 = vld [vmem:[#allocation6 + $0x2] ss:$4 sm:$0x3]  ;;  %v778_v35 = vld [vmem:[#allocation6 + $0x3] ss:$4 sm:$0x3] }
 0x2f4   :  { %1295 = vtanh.f32 %v604_v40  ;;  %v1117_v42 = vmul.f32 -1.442695, %v604_v40 }
 0x2f6   :  { %1297 = vpow2.f32 %v1117_v42 }
 0x2fe   :  { %v1296_v41 = vpop.eup %1295 }
 0x2ff   :  { %614 = vrot.lane.b32.xlu0 %v1296_v41, %s1358_s18 }
 0x300   :  { %v1298_v43 = vpop.eup %1297 }
 0x301   :  { %v608_v44 = vadd.f32 1.0, %v1298_v43 }
 0x303   :  { %1299 = vrcp.f32 %v608_v44 }
 0x30d   :  { %v1300_v45 = vpop.eup %1299 }
 0x30e   :  { %v612_v48 = vmul.f32 0.0, %v1300_v45 }
 0x371   :  { %v615_v46 = vpop.permute.xlu0 %614 }
 0x372   :  { %v617_v47 = vmul.f32 %v1300_v45, %v615_v46 }
 0x374   :  { %619 = vrot.lane.b32.xlu0 %v617_v47, %s1358_s18 }
 0x3e6   :  { %v620_v49 = vpop.permute.xlu0 %619 }
 0x3e7   :  { %v622_v50 = vadd.f32 %v620_v49, %v612_v48  ;;  %v1124_v48 = vld [vmem:[%s1661_s8] ss:$0 sm:$0xff] }
 0x3e9   :  { %1301 = vtanh.f32 %v622_v50 }
 0x3f3   :  { %v1302_v51 = vpop.eup %1301 }
 0x3f4   :  { %625 = vrot.lane.b32.xlu1 %v1302_v51, %s1358_s18 }
 0x466   :  { %v626_v52 = vpop.permute.xlu1 %625 }
 0x467   :  { %v628_v53 = vmul.f32 %v1300_v45, %v626_v52  ;;  %v1290_v52 = vld [vmem:[%s1663_s10] sm:$0xff]  }
 0x469   :  { %v631_v54 = vpack.c.bf16 %v628_v53, %v628_v53 }
 0x46b   :  { %633 = vrot.lane.b32.xlu1 %v631_v54, %s1359_s6  ;;  %v1291_v54 = vld [vmem:[%s1663_s10 + $0x8] sm:$0xff]  }
 0x4dd   :  { %v634_v55 = vpop.permute.xlu1 %633 }
 0x4de   :  { %1229 = vmatmul.mubr.msk.bf16.vlgmr.msra.gmra.mrb[8].mxu0 %vm560_vm8, %v634_v55  ;;  %v1125_v55 = vld [vmem:[%s1662_s9] ss:$0 sm:$0xff] }
 0x4df   :  { %1241 = vmatpush3.bf16.msra.mxu0 %v1537_v0  ;;  %1244 = vmatprep.mubr.msk.bf16.mxu0 %vm1356_vm5, %v1355_v7 }
 0x4e0   :  { %1242 = vmatprep.subr.bf16.mxu0 %v1355_v7 }
 0x4e3   :  { %1243 = vmatpush3.bf16.msra.mxu0 %v1543_v1 }
 0x4e4   :  { %1256 = vmatprep.subr.bf16.mxu0 %v1355_v7 }
 0x5b1   :  { %v672_v57 = vpop.f32.mrb[8].mxu0 }
 0x5b2   :  { %v678_v58 = vadd.f32 %v672_v57, %v630_v56  ;;  %v1230_v59 = vpop.f32.mrb[9].mxu0  ;;  %v1292_v56 = vld [vmem:[%s1665_s12] sm:$0xff]  }
 0x5b3   :  { %v675_v60 = vpop.f32.mrb[10].mxu0 }
 0x5b4   :  { %1303 = vtanh.f32 %v678_v58  ;;  %v1231_v61 = vpop.f32.mrb[11].mxu0  ;;  %v1119_v63 = vmul.f32 -1.442695, %v678_v58 }
 0x5b6   :  { %1305 = vpow2.f32 %v1119_v63 }
 0x5be   :  { %v1304_v62 = vpop.eup %1303 }
 0x5bf   :  { %688 = vrot.lane.b32.xlu0 %v1304_v62, %s1358_s18 }
 0x5c0   :  { %v1306_v0 = vpop.eup %1305 }
 0x5c1   :  { %v682_v2 = vadd.f32 1.0, %v1306_v0 }
 0x5c3   :  { %1307 = vrcp.f32 %v682_v2 }
 0x5cd   :  { %v1308_v3 = vpop.eup %1307 }
 0x5ce   :  { %v686_v5 = vmul.f32 %v1308_v3, %v622_v50 }
 0x631   :  { %v689_v4 = vpop.permute.xlu0 %688 }
 0x632   :  { %v691_v1 = vmul.f32 %v1308_v3, %v689_v4  ;;  %v1294_v4 = vld [vmem:[%s1667_s14] sm:$0xff]  }
 0x634   :  { %693 = vrot.lane.b32.xlu1 %v691_v1, %s1358_s18  ;;  %v1126_v1 = vld [vmem:[%s1664_s11] ss:$0 sm:$0xff] }
 0x6a6   :  { %v694_v6 = vpop.permute.xlu1 %693 }
 0x6a7   :  { %v696_v8 = vadd.f32 %v694_v6, %v686_v5 }
 0x6a9   :  { %1309 = vtanh.f32 %v696_v8 }
 0x6b3   :  { %v1310_v9 = vpop.eup %1309 }
 0x6b4   :  { %699 = vrot.lane.b32.xlu0 %v1310_v9, %s1358_s18 }
 0x726   :  { %v700_v10 = vpop.permute.xlu0 %699 }
 0x727   :  { %v702_v11 = vmul.f32 %v1308_v3, %v700_v10  ;;  %v1293_v3 = vld [vmem:[%s1665_s12 + $0x8] sm:$0xff]  }
 0x729   :  { %v705_v12 = vpack.c.bf16 %v702_v11, %v702_v11 }
 0x72b   :  { %707 = vrot.lane.b32.xlu1 %v705_v12, %s1359_s6  ;;  %v1130_v12 = vld [vmem:[%s1666_s13] ss:$0 sm:$0xff]  ;;  %s1360_s13 = smov [#allocation7]  }
 0x79d   :  { %v708_v13 = vpop.permute.xlu1 %707 }
 0x79e   :  { %1237 = vmatmul.mubr.msk.bf16.vlgmr.msra.gmra.mrb[16].mxu1 %vm560_vm8, %v708_v13 }
 0x79f   :  { %1252 = vmatprep.mubr.msk.bf16.mxu1 %vm1356_vm5, %v1355_v7  ;;  %1249 = vmatpush3.bf16.msra.mxu1 %v1290_v52 }
 0x7a0   :  { %1250 = vmatprep.subr.bf16.mxu1 %v1355_v7 }
 0x7a3   :  { %1251 = vmatpush3.bf16.msra.mxu1 %v1291_v54 }
 0x7a4   :  { %1264 = vmatprep.subr.bf16.mxu1 %v1355_v7 }
 0x871   :  { %v746_v15 = vpop.f32.mrb[16].mxu1 }
 0x872   :  { %v752_v16 = vadd.f32 %v746_v15, %v704_v14  ;;  %v1238_v17 = vpop.f32.mrb[17].mxu1 }
 0x873   :  { %v749_v18 = vpop.f32.mrb[18].mxu1 }
 0x874   :  { %1311 = vtanh.f32 %v752_v16  ;;  %v1239_v19 = vpop.f32.mrb[19].mxu1  ;;  %v1121_v21 = vmul.f32 -1.442695, %v752_v16 }
 0x876   :  { %1313 = vpow2.f32 %v1121_v21 }
 0x87e   :  { %v1312_v20 = vpop.eup %1311 }
 0x87f   :  { %762 = vrot.lane.b32.xlu0 %v1312_v20, %s1358_s18  ;;  %v1134_v20 = vld [vmem:[%s1668_s15] ss:$0 sm:$0xff]  ;;  %s1089_s15 = sshll.u32 %s1360_s13, 4  ;;  %s1090_s15 = int_to_ptr.vmem [resolvable:$true] %s1089_s15 }
 0x880   :  { %v1314_v22 = vpop.eup %1313  ;;  %s1331_s30 = scalar_lea.vmem %s1090_s15, 32  ;;  %p1336_p1 = scmp.lt.s32.totalorder %s1090_s15, %s1090_s15 }
 0x881   :  { %v756_v23 = vadd.f32 1.0, %v1314_v22  ;;  %p1332_p0 = scmp.ne.s32.totalorder %s1090_s15, %s1331_s30  ;;  %p1337_p2 = scmp.lt.s32.totalorder %s1331_s30, %s1331_s30 }
 0x883   :  { %1315 = vrcp.f32 %v756_v23  ;;  %p1338_p3 = por %p1337_p2, %p1336_p1 }
 0x885   :  { %p1339_p4 = pnand %p1338_p3, %p1332_p0 }
 0x88d   :  { %v1316_v24 = vpop.eup %1315 }
 0x88e   :  { %v760_v27 = vmul.f32 %v1316_v24, %v696_v8 }
 0x8f1   :  { %v763_v25 = vpop.permute.xlu0 %762 }
 0x8f2   :  { %v765_v26 = vmul.f32 %v1316_v24, %v763_v25 }
 0x8f4   :  { %767 = vrot.lane.b32.xlu1 %v765_v26, %s1358_s18 }
 0x966   :  { %v768_v28 = vpop.permute.xlu1 %767 }
 0x967   :  { %v770_v29 = vadd.f32 %v768_v28, %v760_v27 }
 0x969   :  { %1317 = vtanh.f32 %v770_v29 }
 0x973   :  { %v1318_v30 = vpop.eup %1317 }
 0x974   :  { %773 = vrot.lane.b32.xlu0 %v1318_v30, %s1358_s18 }
 0x9e6   :  { %v774_v31 = vpop.permute.xlu0 %773 }
 0x9e7   :  { %v776_v32 = vmul.f32 %v1316_v24, %v774_v31 }
 0x9e9   :  { %v779_v33 = vpack.c.bf16 %v776_v32, %v776_v32 }
 0x9eb   :  { %781 = vrot.lane.b32.xlu1 %v779_v33, %s1359_s6 }
 0xa5d   :  { %v782_v34 = vpop.permute.xlu1 %781 }
 0xa5e   :  { %1245 = vmatmul.mubr.msk.bf16.vlgmr.msra.gmra.mrb[12].mxu0 %vm560_vm8, %v782_v34 }
 0xa5f   :  { %1260 = vmatprep.mubr.msk.bf16.mxu0 %vm1356_vm5, %v1355_v7  ;;  %1257 = vmatpush3.bf16.msra.mxu0 %v1292_v56 }
 0xa60   :  { %1258 = vmatprep.subr.bf16.mxu0 %v1355_v7 }
 0xa63   :  { %1259 = vmatpush3.bf16.msra.mxu0 %v1293_v3 }
 0xb31   :  { %v820_v36 = vpop.f32.mrb[12].mxu0 }
 0xb32   :  { %v826_v37 = vadd.f32 %v820_v36, %v778_v35  ;;  %v1246_v38 = vpop.f32.mrb[13].mxu0 }
 0xb33   :  { %v823_v39 = vpop.f32.mrb[14].mxu0 }
 0xb34   :  { %1319 = vtanh.f32 %v826_v37  ;;  %v1247_v40 = vpop.f32.mrb[15].mxu0  ;;  %v1123_v42 = vmul.f32 -1.442695, %v826_v37 }
 0xb36   :  { %1321 = vpow2.f32 %v1123_v42 }
 0xb3e   :  { %v1320_v41 = vpop.eup %1319 }
 0xb3f   :  { %836 = vrot.lane.b32.xlu0 %v1320_v41, %s1358_s18 }
 0xb40   :  { %v1322_v43 = vpop.eup %1321 }
 0xb41   :  { %v830_v44 = vadd.f32 1.0, %v1322_v43 }
 0xb43   :  { %1323 = vrcp.f32 %v830_v44 }
 0xb4d   :  { %v1324_v45 = vpop.eup %1323 }
 0xb4e   :  { %v834_v49 = vmul.f32 %v1324_v45, %v770_v29 }
 0xbb1   :  { %v837_v46 = vpop.permute.xlu0 %836 }
 0xbb2   :  { %v839_v47 = vmul.f32 %v1324_v45, %v837_v46 }
 0xbb4   :  { %841 = vrot.lane.b32.xlu1 %v839_v47, %s1358_s18 }
 0xbb8   :  { %857 = vrot.lane.b32.xlu1 %v1124_v48, %s1359_s6 }
 0xc26   :  { %v842_v50 = vpop.permute.xlu1 %841 }
 0xc27   :  { %v844_v51 = vadd.f32 %v842_v50, %v834_v49 }
 0xc29   :  { %1325 = vtanh.f32 %v844_v51 }
 0xc2a   :  { %v858_v58 = vpop.permute.xlu1 %857 }
 0xc33   :  { %v1326_v53 = vpop.eup %1325 }
 0xc34   :  { %847 = vrot.lane.b32.xlu0 %v1326_v53, %s1358_s18 }
 0xc38   :  { %867 = vrot.lane.b32.xlu0 %v1125_v55, %s1359_s6 }
 0xca6   :  { %v848_v57 = vpop.permute.xlu0 %847 }
 0xca7   :  { %v850_v59 = vmul.f32 %v1324_v45, %v848_v57 }
 0xca9   :  { %v860_v60 = vmul.f32 %v858_v58, %v850_v59 }
 0xcaa   :  { %v868_v61 = vpop.permute.xlu0 %867 }
 0xcab   :  { %v870_v62 = vadd.f32 %v868_v61, %v860_v60 }
 0xcad   :  { %v871_v63 = vmax.f32 %v870_v62, 0.0 }
 0xcaf   :  { %v872_v0 = vpack.c.bf16 %v871_v63, %v871_v63 }
 0xcb1   :  { %885 = vrot.lane.b32.xlu1 %v872_v0, %s1359_s6 }
 0xd23   :  { %v886_v2 = vpop.permute.xlu1 %885 }
 0xd24   :  { %1253 = vmatmul.mubr.msk.bf16.vlgmr.msra.gmra.mrb[20].mxu1 %vm560_vm8, %v886_v2 }
 0xd25   :  { %1266 = vmatprep.mubr.msk.bf16.mxu1 %vm1356_vm5, %v1355_v7  ;;  %1265 = vmatpush3.bf16.msra.mxu1 %v1294_v4 }
 0xdf7   :  { %v936_v5 = vpop.f32.mrb[20].mxu1 }
 0xdf8   :  { %v937_v6 = vadd.f32 %v1126_v1, %v936_v5  ;;  %v1254_v8 = vpop.f32.mrb[21].mxu1 }
 0xdf9   :  { %v939_v9 = vpop.f32.mrb[22].mxu1 }
 0xdfa   :  { %v942_v10 = vmax.f32 %v937_v6, 0.0  ;;  %v1255_v7 = vpop.f32.mrb[23].mxu1 }
 0xdfc   :  { %v943_v11 = vpack.c.bf16 %v942_v10, %v942_v10 }
 0xdfe   :  { %1261 = vmatmul.mubr.msk.bf16.vlgmr.msra.gmra.mrb[16].mxu0 %vm560_vm8, %v943_v11 }
 0xed1   :  { %v1004_v13 = vpop.f32.mrb[16].mxu0 }
 0xed2   :  { %v1005_v14 = vadd.f32 %v1130_v12, %v1004_v13  ;;  %v1262_v15 = vpop.f32.mrb[17].mxu0 }
 0xed3   :  { %v1007_v16 = vpop.f32.mrb[18].mxu0 }
 0xed4   :  { %v1010_v17 = vmax.f32 %v1005_v14, 0.0  ;;  %v1263_v18 = vpop.f32.mrb[19].mxu0 }
 0xed6   :  { %v1011_v19 = vpack.c.bf16 %v1010_v17, %v1010_v17 }
 0xed8   :  { %1267 = vmatmul.mubr.msk.bf16.vlgmr.msra.gmra.mrb[24].mxu1 %vm476_vm7, %v1011_v19 }
 0xfab   :  { %v1064_v21 = vpop.f32.mrb[24].mxu1 }
 0xfac   :  { %v1065_v22 = vadd.f32 %v1134_v20, %v1064_v21  ;;  %v1268_v23 = vpop.f32.mrb[25].mxu1 }
 0xfad   :  { %v1067_v24 = vpop.f32.mrb[26].mxu1 }
 0xfae   :  { %v1269_v25 = vpop.f32.mrb[27].mxu1  ;;  %v1071_v26 = vsel %vm1070_vm9, %v1065_v22, -inf }
 0xfaf   :  { %1072 = vmax.xlane.f32.xlu0 %v1071_v26 }
0x103c   :  { %v1073_v27 = vpop.xlane.xlu0 %1072 }
0x103d   :  { %v1074_v28 = vsub.f32 %v1065_v22, %v1073_v27 }
0x103f   :  { %v1075_v29 = vmul.f32 1.442695, %v1074_v28 }
0x1041   :  { %1327 = vpow2.f32 %v1075_v29 }
0x104b   :  { %v1328_v30 = vpop.eup %1327 }
0x104c   :  { %v1077_v31 = vsel %vm1070_vm9, %v1328_v30, 0.0 }
0x104d   :  { %1078 = vadd.xlane.f32.xlu1 %v1077_v31 }
0x10da   :  { %v1079_v32 = vpop.xlane.xlu1 %1078 }
0x10db   :  { %1329 = vrcp.f32 %v1079_v32 }
0x10e5   :  { %v1330_v33 = vpop.eup %1329 }
0x10e6   :  { %v1081_v34 = vmul.f32 %v1330_v33, %v1328_v30 }
0x10e8   :  { %1082 = vst.msk [vmem:[#allocation7] sm:$0x3] %vm1070_vm9, %v1081_v34 }
0x10e9   :  { %1342 = shalt.err (!%p1339_p4)
}
0x10ea   :  { %s1343_s7 = scalar_lea.hbm %s1669_s16, 32 }
0x10eb   :  { %p1344_p5 = scmp.ne.s32.totalorder %s1669_s16, %s1343_s7  ;;  %p1347_p6 = scmp.lt.u32.totalorder %s1343_s7, %s1669_s16 }
0x10ed   :  { %p1349_p7 = pnand %p1347_p6, %p1344_p5 }
0x10ef   :  { %1352 = shalt.err (!%p1349_p7)
}
0x10f0   :  { %1092 = dma.vmem_to_hbm [thread:$0]  %s1090_s15, 32, %s1669_s16, [#allocation8]  }
0x10f1   :  { %1353 = dma.done.wait [#allocation8], 32  }
0x10f2   :  { %1354 = vsyncadd [#allocation8], 4294967264 }
0x10f3   :  { %1096 = vsyncpa [#allocation8], 1 }

</bundles_post_ra>
